<compile_context>
chip_gen: v6e
topology: v6e:2x2x1
jax: 0.10.0
libtpu: 0.0.40
codegen_flags: <defaults>
</compile_context>

<pallas_src>
import functools
import math

import jax
import jax.numpy as jnp
from jax.experimental import pallas as pl
from jax.experimental.pallas import tpu as pltpu

_LANE = 128
_NEG_SLOPE = 0.2


def _round_up(x, m):
    return ((x + m - 1) // m) * m


# ----------------------- generation-aware VMEM budgeting ----------------------

def _tpu_vmem_bytes():
    try:
        info = pltpu.get_tpu_info()
        v = getattr(info, "vmem_capacity_bytes", None)
        if v:
            return int(v)
    except Exception:
        pass
    return 64 * 1024 * 1024  # conservative default (v7x per-TC VMEM)


def _vmem_budget_and_limit():
    vmem = _tpu_vmem_bytes()
    # ~3/8 of physical VMEM as the per-step working-set budget, ~3/4 as the
    # compiler limit: 48 / 96 MiB on v5e/v6e (128 MiB), 24 / 48 MiB on v7x.
    return (3 * vmem) // 8, (3 * vmem) // 4


# ======================= path 1: small channels (9*cin <= 128) ================
# Host-side fold of the 3x3 neighbourhood into the channel dim (im2col built
# once, in the same layout/dtype pass XLA must do anyway) -> the kernel is a
# single lane-dense matmul per tile with no halo handling at all.

def _im2col_matmul_kernel(x_ref, w_ref, b_ref, o_ref):
    """x_ref: (1, bm, Kp) bf16 | w_ref: (Kp, Coutp) bf16 | b_ref: (1, Coutp) f32
    o_ref: (1, bm, Coutp) bf16."""
    acc = jnp.dot(x_ref[0], w_ref[...], preferred_element_type=jnp.float32)
    acc = acc + b_ref[...]                               # bias, f32
    acc = jnp.where(acc >= 0, acc, _NEG_SLOPE * acc)     # LeakyReLU(0.2), f32
    o_ref[0] = acc.astype(o_ref.dtype)


def _pick_block_m(m, k_p, cout_p, budget):
    """Largest multiple-of-8 divisor of M whose working set fits the budget."""
    best = None
    for bm in range(8, m + 1, 8):
        if m % bm:
            continue
        need = (2 * bm * k_p * 2        # double-buffered input block (bf16)
                + 2 * bm * cout_p * 2   # double-buffered output block (bf16)
                + 2 * k_p * cout_p * 2  # weights (double-buffered)
                + bm * cout_p * 4       # f32 activations before the cast
                + bm * k_p * 2)         # LHS staging headroom
        if need <= budget:
            best = bm
    return best if best is not None else m


def _forward_im2col(x_nchw, weight, bias):
    n, cin, h, w = x_nchw.shape
    cout = weight.shape[0]
    k = 9 * cin
    k_p = _round_up(k, _LANE)
    cout_p = _round_up(cout, _LANE)
    m = h * w

    # NCHW -> NHWC, pad H/W by 1, fold the 9 taps into channels, pad K to one
    # lane group, flatten spatial so every block is sublane/lane aligned.
    xt = jnp.transpose(x_nchw, (0, 2, 3, 1))
    xp = jnp.pad(xt, ((0, 0), (1, 1), (1, 1), (0, 0)))
    cols = [xp[:, dy:dy + h, dx:dx + w, :] for dy in range(3) for dx in range(3)]
    x_cols = jnp.concatenate(cols, axis=-1)                       # (N,H,W,9*cin)
    x_cols = jnp.pad(x_cols, ((0, 0), (0, 0), (0, 0), (0, k_p - k)))
    x_cols = x_cols.astype(jnp.bfloat16).reshape(n, m, k_p)

    # (Cout,Cin,3,3) -> (ky,kx,cin,cout) -> (9*cin, cout), matching col order.
    w_t = jnp.transpose(weight, (2, 3, 1, 0)).reshape(k, cout)
    w_t = jnp.pad(w_t, ((0, k_p - k), (0, cout_p - cout))).astype(jnp.bfloat16)
    b_t = jnp.pad(bias, (0, cout_p - cout)).reshape(1, cout_p).astype(jnp.float32)

    budget, limit = _vmem_budget_and_limit()
    bm = _pick_block_m(m, k_p, cout_p, budget)

    cost = pl.CostEstimate(
        flops=2 * n * h * w * 9 * cin * cout,
        transcendentals=0,
        bytes_accessed=(x_cols.size * 2 + w_t.size * 2 + b_t.size * 4
                        + n * m * cout_p * 2))

    out = pl.pallas_call(
        _im2col_matmul_kernel,
        out_shape=jax.ShapeDtypeStruct((n, m, cout_p), jnp.bfloat16),
        grid_spec=pltpu.PrefetchScalarGridSpec(
            num_scalar_prefetch=0,
            grid=(n, m // bm),
            in_specs=[
                pl.BlockSpec((1, bm, k_p), lambda ni, mi: (ni, mi, 0)),
                pl.BlockSpec((k_p, cout_p), lambda ni, mi: (0, 0)),
                pl.BlockSpec((1, cout_p), lambda ni, mi: (0, 0)),
            ],
            out_specs=pl.BlockSpec((1, bm, cout_p), lambda ni, mi: (ni, mi, 0))),
        compiler_params=pltpu.CompilerParams(
            dimension_semantics=("parallel", "parallel"),
            vmem_limit_bytes=limit),
        cost_estimate=cost,
    )(x_cols, w_t, b_t)

    out = out.reshape(n, h, w, cout_p)[..., :cout]
    return jnp.transpose(out, (0, 3, 1, 2)).astype(jnp.float32)


# ======================= path 2: generic channel counts =======================
# Manual double-buffered halo DMA over row blocks; 9 accumulated MXU dots on
# the (dy, dx)-shifted views; f32 VMEM accumulator scratch.

def _conv3x3_halo_kernel(x_hbm, w_ref, b_ref, o_ref, xbuf, sem, acc_ref):
    """One (batch, row-block) step of Conv2d(3x3, pad=1, bias) + LeakyReLU.

    x_hbm   : (N, H+2, W+2, Cin_p)   bf16, zero padded, in HBM (pl.ANY)
    w_ref   : (3, 3, Cin_p, Cout_p)  bf16
    b_ref   : (1, Cout_p)            f32
    o_ref   : (1, BR, W, Cout_p)     bf16 output row block
    xbuf    : (2, BR+2, W+2, Cin_p)  bf16 manual double buffer
    sem     : (2,)                   DMA semaphores
    acc_ref : (BR*W, Cout_p)         f32 VMEM accumulator
    """
    n = pl.program_id(0)
    rb = pl.program_id(1)
    nb = pl.num_programs(1)

    br = o_ref.shape[1]
    w_out = o_ref.shape[2]
    cout_p = o_ref.shape[3]
    cin_p = x_hbm.shape[3]

    slot = rb % 2

    def copy_in(row_block, buf_slot):
        return pltpu.make_async_copy(
            x_hbm.at[n, pl.ds(row_block * br, br + 2)],
            xbuf.at[buf_slot], sem.at[buf_slot])

    # Prime the pipeline at the first row block of this image.
    @pl.when(rb == 0)
    def _():
        copy_in(rb, slot).start()

    # Prefetch the next row block into the other buffer while we compute.
    @pl.when(rb + 1 < nb)
    def _():
        copy_in(rb + 1, 1 - slot).start()

    # Wait for the current row block (+2 halo rows).
    copy_in(rb, slot).wait()

    # 9 accumulated dots directly on the shifted views (no im2col concat);
    # the f32 accumulator lives in VMEM so nothing spills to/from vregs.
    first = True
    for dy in range(3):                                  # static, unrolled
        rows = xbuf[slot, dy:dy + br]                    # (br, W+2, cin_p)
        for dx in range(3):
            lhs = rows[:, dx:dx + w_out, :].reshape(br * w_out, cin_p)
            contrib = jnp.dot(lhs, w_ref[dy, dx],
                              preferred_element_type=jnp.float32)
            if first:
                acc_ref[...] = contrib
                first = False
            else:
                acc_ref[...] += contrib

    acc = acc_ref[...] + b_ref[...]                      # bias, f32
    acc = jnp.where(acc >= 0, acc, _NEG_SLOPE * acc)     # LeakyReLU(0.2), f32
    o_ref[...] = acc.reshape(1, br, w_out, cout_p).astype(o_ref.dtype)


def _pick_block_rows(h, w, cin_p, cout_p, budget):
    """Largest divisor of H whose per-step working set fits the budget."""
    best = 1
    weight_bytes = 2 * 9 * cin_p * cout_p * 2            # double-buffered bf16 weights
    for br in range(1, h + 1):
        if h % br:
            continue
        xbuf = 2 * (br + 2) * (w + 2) * cin_p * 2         # manual double buffer
        outb = 2 * br * w * cout_p * 2                    # pipelined bf16 output
        accb = br * w * cout_p * 4                        # f32 VMEM accumulator
        lhsb = br * w * cin_p * 2                         # one LHS tile of staging
        if weight_bytes + xbuf + outb + accb + lhsb <= budget:
            best = br
    return best


def _forward_general(x_nchw, weight, bias, block_rows=None):
    n, cin, h, w = x_nchw.shape
    cout = weight.shape[0]
    cin_p = _round_up(cin, _LANE)
    cout_p = _round_up(cout, _LANE)

    # NCHW -> NHWC, zero pad H/W by 1 (conv padding=1), pad channels to a lane
    # multiple, cast bf16 -- all fused into the one layout pass XLA does anyway.
    x = jnp.transpose(x_nchw, (0, 2, 3, 1))
    x = jnp.pad(x, ((0, 0), (1, 1), (1, 1), (0, cin_p - cin)))
    x = x.astype(jnp.bfloat16)

    w_t = jnp.transpose(weight, (2, 3, 1, 0))             # (ky, kx, cin, cout)
    w_t = jnp.pad(w_t, ((0, 0), (0, 0), (0, cin_p - cin), (0, cout_p - cout)))
    w_t = w_t.astype(jnp.bfloat16)
    b_t = jnp.pad(bias, (0, cout_p - cout)).reshape(1, cout_p).astype(jnp.float32)

    budget, limit = _vmem_budget_and_limit()
    if block_rows is None:
        block_rows = _pick_block_rows(h, w, cin_p, cout_p, budget)
    if h % block_rows:
        raise ValueError(f"block_rows={block_rows} must divide H={h}")
    nb = h // block_rows

    cost = pl.CostEstimate(
        flops=2 * n * h * w * 9 * cin * cout,
        transcendentals=0,
        bytes_accessed=(x.size * 2 + w_t.size * 2 + b_t.size * 4
                        + n * h * w * cout_p * 2))

    out = pl.pallas_call(
        _conv3x3_halo_kernel,
        out_shape=jax.ShapeDtypeStruct((n, h, w, cout_p), jnp.bfloat16),
        grid_spec=pltpu.PrefetchScalarGridSpec(
            num_scalar_prefetch=0,
            grid=(n, nb),
            in_specs=[
                pl.BlockSpec(memory_space=pl.ANY),                    # x in HBM
                pl.BlockSpec((3, 3, cin_p, cout_p),
                             lambda ni, ri: (0, 0, 0, 0)),
                pl.BlockSpec((1, cout_p), lambda ni, ri: (0, 0)),
            ],
            out_specs=pl.BlockSpec((1, block_rows, w, cout_p),
                                   lambda ni, ri: (ni, ri, 0, 0)),
            scratch_shapes=[
                pltpu.VMEM((2, block_rows + 2, w + 2, cin_p), jnp.bfloat16),
                pltpu.SemaphoreType.DMA((2,)),
                pltpu.VMEM((block_rows * w, cout_p), jnp.float32),
            ]),
        compiler_params=pltpu.CompilerParams(
            dimension_semantics=("parallel", "arbitrary"),
            vmem_limit_bytes=limit),
        cost_estimate=cost,
    )(x, w_t, b_t)

    out = out[..., :cout]                          # drop channel padding
    return jnp.transpose(out, (0, 3, 1, 2)).astype(jnp.float32)   # NHWC -> NCHW


# --------------------------------- dispatch -----------------------------------

def conv_block_forward(x_nchw, weight, bias, *, block_rows=None):
    """ConvBlock forward: Conv2d(k=3, padding=1, bias=True) + LeakyReLU(0.2).

    x_nchw : (N, Cin, H, W)    float32   (PyTorch NCHW layout)
    weight : (Cout, Cin, 3, 3) float32   (PyTorch Conv2d layout)
    bias   : (Cout,)           float32
    returns: (N, Cout, H, W)   float32
    """
    cin = x_nchw.shape[1]
    if 9 * cin <= _LANE and block_rows is None:
        return _forward_im2col(x_nchw, weight, bias)
    return _forward_general(x_nchw, weight, bias, block_rows=block_rows)


# ---------------------------------- main --------------------------------------

def _reference_conv_block(x, weight, bias):
    y = jax.lax.conv_general_dilated(
        x, weight, window_strides=(1, 1), padding=((1, 1), (1, 1)),
        dimension_numbers=("NCHW", "OIHW", "NCHW"),
        precision=jax.lax.Precision.HIGHEST)
    y = y + bias.reshape(1, -1, 1, 1)
    return jnp.where(y >= 0, y, _NEG_SLOPE * y)


if __name__ == "__main__":
    key = jax.random.PRNGKey(0)

    def run_case(tag, n, cin, cout, h, w, **kw):
        kx, kw_, kb = jax.random.split(jax.random.fold_in(key, cin), 3)
        fan_in = cin * 3 * 3
        bound = 1.0 / math.sqrt(fan_in)     # PyTorch Conv2d default init range
        x = jax.random.normal(kx, (n, cin, h, w), dtype=jnp.float32)
        weight = jax.random.uniform(kw_, (cout, cin, 3, 3), jnp.float32,
                                    -bound, bound)
        bias = jax.random.uniform(kb, (cout,), jnp.float32, -bound, bound)

        fwd = jax.jit(functools.partial(conv_block_forward, **kw))
        y = jax.block_until_ready(fwd(x, weight, bias))
        assert y.shape == (n, cout, h, w), (tag, y.shape)
        assert bool(jnp.all(jnp.isfinite(y))), tag

        ref = _reference_conv_block(x, weight, bias)
        # bf16 MXU inputs + bf16 output vs f32 HIGHEST reference.
        tol = 5e-2 + (2.0 ** -8) * float(jnp.max(jnp.abs(ref)))
        err = float(jnp.max(jnp.abs(y - ref)))
        assert err < tol, f"{tag}: max abs error {err} > {tol}"

    # Small-channel / fused-9-tap matmul path (the module's typical first block).
    run_case("im2col", n=2, cin=4, cout=8, h=16, w=16)
    # Generic path: manual halo DMA + 9 accumulated dots; block_rows=8 gives a
    # (2 batches x 2 row blocks) grid so the prefetch chain is exercised.
    run_case("general", n=2, cin=16, cout=32, h=16, w=16, block_rows=8)

    print("KERNEL_OK")
</pallas_src>

<mosaic_0001>
module attributes {stable_mosaic.version = 11 : i64} {
  func.func @_im2col_matmul_kernel(%arg0: i32, %arg1: i32, %arg2: memref<1x256x128xbf16, #tpu.memory_space<vmem>>, %arg3: memref<128x128xbf16, #tpu.memory_space<vmem>>, %arg4: memref<1x128xf32, #tpu.memory_space<vmem>>, %arg5: memref<1x256x128xbf16, #tpu.memory_space<vmem>>) attributes {dimension_semantics = [#tpu.dimension_semantics<parallel>, #tpu.dimension_semantics<parallel>], iteration_bounds = array<i64: 2, 1>, scalar_prefetch = 0 : i64, scratch_operands = 0 : i64, tpu.core_type = #tpu.core_type<tc>, window_params = [{transform_indices = @transform_0, window_bounds = array<i64: 1, 256, 128>}, {pipeline_mode = #tpu.pipeline_mode<synchronous>, transform_indices = @transform_1, window_bounds = array<i64: 128, 128>}, {pipeline_mode = #tpu.pipeline_mode<synchronous>, transform_indices = @transform_2, window_bounds = array<i64: 1, 128>}, {transform_indices = @transform_3, window_bounds = array<i64: 1, 256, 128>}]} {
    %c0 = arith.constant 0 : index
    %c0_0 = arith.constant 0 : index
    %c0_1 = arith.constant 0 : index
    %0 = vector.load %arg2[%c0, %c0_0, %c0_1] : memref<1x256x128xbf16, #tpu.memory_space<vmem>>, vector<1x256x128xbf16>
    %1 = vector.shape_cast %0 : vector<1x256x128xbf16> to vector<256x128xbf16>
    %c0_2 = arith.constant 0 : index
    %c0_3 = arith.constant 0 : index
    %2 = vector.load %arg3[%c0_2, %c0_3] : memref<128x128xbf16, #tpu.memory_space<vmem>>, vector<128x128xbf16>
    %cst = arith.constant dense<0.000000e+00> : vector<256x128xf32>
    %3 = tpu.matmul %1, %2, %cst {dimension_numbers = #tpu.dot_dimension_numbers<[1], [0], [0], [1], [0, 0, 1, 1], [], []>} : vector<256x128xbf16>, vector<128x128xbf16>, vector<256x128xf32> -> vector<256x128xf32>
    %c0_4 = arith.constant 0 : index
    %c0_5 = arith.constant 0 : index
    %4 = vector.load %arg4[%c0_4, %c0_5] : memref<1x128xf32, #tpu.memory_space<vmem>>, vector<1x128xf32>
    %5 = vector.broadcast %4 : vector<1x128xf32> to vector<256x128xf32>
    %6 = arith.addf %3, %5 : vector<256x128xf32>
    %cst_6 = arith.constant 0.000000e+00 : f32
    %7 = vector.broadcast %cst_6 : f32 to vector<256x128xf32>
    %8 = arith.cmpf oge, %6, %7 : vector<256x128xf32>
    %cst_7 = arith.constant 2.000000e-01 : f32
    %9 = vector.broadcast %cst_7 : f32 to vector<256x128xf32>
    %10 = arith.mulf %9, %6 : vector<256x128xf32>
    %11 = arith.select %8, %6, %10 : vector<256x128xi1>, vector<256x128xf32>
    %12 = arith.truncf %11 : vector<256x128xf32> to vector<256x128xbf16>
    %c0_8 = arith.constant 0 : index
    %c0_9 = arith.constant 0 : index
    %c0_10 = arith.constant 0 : index
    %13 = vector.load %arg5[%c0_8, %c0_9, %c0_10] : memref<1x256x128xbf16, #tpu.memory_space<vmem>>, vector<1x256x128xbf16>
    %14 = vector.shape_cast %13 : vector<1x256x128xbf16> to vector<256x128xbf16>
    %15 = vector.shape_cast %12 : vector<256x128xbf16> to vector<1x256x128xbf16>
    tpu.vector_store %arg5[%c0_8, %c0_9, %c0_10], %15 {strides = array<i32>} : memref<1x256x128xbf16, #tpu.memory_space<vmem>>, vector<1x256x128xbf16>,
    return
  }
  func.func @transform_0(%arg0: i32, %arg1: i32) -> (i32, i32, i32) {
    %c0_i32 = arith.constant 0 : i32
    %c0_i32_0 = arith.constant 0 : i32
    return %arg0, %arg1, %c0_i32 : i32, i32, i32
  }
  func.func @transform_1(%arg0: i32, %arg1: i32) -> (i32, i32) {
    %c0_i32 = arith.constant 0 : i32
    %c0_i32_0 = arith.constant 0 : i32
    %c0_i32_1 = arith.constant 0 : i32
    return %c0_i32, %c0_i32_0 : i32, i32
  }
  func.func @transform_2(%arg0: i32, %arg1: i32) -> (i32, i32) {
    %c0_i32 = arith.constant 0 : i32
    %c0_i32_0 = arith.constant 0 : i32
    %c0_i32_1 = arith.constant 0 : i32
    return %c0_i32, %c0_i32_0 : i32, i32
  }
  func.func @transform_3(%arg0: i32, %arg1: i32) -> (i32, i32, i32) {
    %c0_i32 = arith.constant 0 : i32
    %c0_i32_0 = arith.constant 0 : i32
    return %arg0, %arg1, %c0_i32 : i32, i32, i32
  }
}

</mosaic_0001>

<bundles_post_ra>
// kernel: conv_block_forward.1
= control target key start
LH: loop header
LB: loop body
LE: loop exit
PB: predicated region body
PF: predicated region fallthrough
CT: control target
= control target key end

     0   :  { %s1291_s12 = smov 0   ;;  %s1293_s13 = smov 0   ;;  %s1432_s0 = inlined_call_operand.vmem [shape: bf16[2,256,128], index: 0, kind: input, shape index: {}]   ;;  %s1433_s1 = inlined_call_operand.vmem [shape: bf16[128,128], index: 1, kind: input, shape index: {}]   ;;  %s1434_s2 = inlined_call_operand.vmem [shape: f32[1,128], index: 2, kind: input, shape index: {}]   ;;  %s1435_s3 = inlined_call_operand.vmem [shape: bf16[2,256,128], index: 3, kind: output, shape index: {}]  }
   0x1   :  { %s1295_s14 = smov 0  }
   0x2 LB: > { %s25_s15 = sadd.s32 1, %s1265_s13  ;;  %p918_p0 = scmp.ge.s32.totalorder %s1269_s14, 1  ;;  %s1269_s14 = sphi %s1295_s14, %s13_s14   ;;  %s1265_s13 = sphi %s1293_s13, %s1437_s13   ;;  %s1261_s12 = sphi %s1291_s12, %s1436_s12  }
   0x3   : > { %p27_p1 = scmp.ge.s32.totalorder %s25_s15, 2  ;;  %p158_p2 = scmp.lt.s32.totalorder %s1269_s14, 3 }
   0x5   : > { %s1439_s15 = smov (%p27_p1, %s25_s15), 0  ;;  %p159_p3 = pnand %p918_p0, %p158_p2 }
   0x6   : > { %p191_p4 = scmp.lt.s32.totalorder (!%p159_p3), %s1261_s12, 1 }
   0x7   : > { %162 = sbr.rel (%p159_p3) target bundleno = 280 (0x118), region = 32 }
   0xc   : > { %v1223_v0 = vld [vmem:[%s1433_s1 + $0x38] sm:$0xff]   ;;  %v1224_v1 = vld [vmem:[%s1433_s1 + $0x30] sm:$0xff]   ;;  %s1441_s12 = smov (!%p191_p4, %s1261_s12), 1  ;;  %v1225_v2 = vld [vmem:[%s1433_s1 + $0x28] sm:$0xff]  }
   0xd   : > { %1135 = vmatprep.subr.bf16.mxu0 %v1223_v0  ;;  %1183 = vmatprep.subr.bf16.mxu1 %v1223_v0  ;;  %s982_s22 = sshll.u32 %s1441_s12, 7  ;;  %v1226_v3 = vld [vmem:[%s1433_s1 + $0x20] sm:$0xff]   ;;  %v1227_v6 = vld [vmem:[%s1433_s1 + $0x18] sm:$0xff]   ;;  %v1228_v7 = vld [vmem:[%s1433_s1 + $0x10] sm:$0xff]  }
   0xe   : > { %1136 = vmatpush3.bf16.msra.mxu0 %v1223_v0  ;;  %1191 = vmatpush3.bf16.msra.mxu1 %v1223_v0  ;;  %s1326_s25 = scalar_lea.vmem %s1432_s0, %s982_s22  ;;  %v1229_v8 = vld [vmem:[%s1433_s1 + $0x8] sm:$0xff]   ;;  %v1230_v9 = vld [vmem:[%s1433_s1] sm:$0xff]   ;;  %s1377_s17 = scalar_lea.vmem %s1435_s3, %s982_s22 }
   0xf   : > { %1137 = vmatprep.subr.bf16.mxu0 %v1224_v1  ;;  %1184 = vmatprep.subr.bf16.mxu1 %v1224_v1  ;;  %v1231_v4 = vld [vmem:[%s1326_s25] sm:$0xff]   ;;  %v1233_v10 = vld [vmem:[%s1326_s25 + $0x8] sm:$0xff]   ;;  %v1235_v12 = vld [vmem:[%s1326_s25 + $0x10] sm:$0xff]  }
  0x10   : > { %v1232_v5 = vld [vmem:[%s1326_s25 + $0x40] sm:$0xff]   ;;  %1151 = vmatprep.mubr.bf16.mxu0 %v1231_v4  ;;  %v1234_v11 = vld [vmem:[%s1326_s25 + $0x48] sm:$0xff]   ;;  %v1236_v13 = vld [vmem:[%s1326_s25 + $0x50] sm:$0xff]  }
  0x11   : > { %1167 = vmatprep.mubr.bf16.mxu1 %v1232_v5  ;;  %v1237_v14 = vld [vmem:[%s1326_s25 + $0x18] sm:$0xff]   ;;  %v1239_v16 = vld [vmem:[%s1326_s25 + $0x20] sm:$0xff]   ;;  %v1241_v18 = vld [vmem:[%s1326_s25 + $0x28] sm:$0xff]  }
  0x12   : > { %1138 = vmatpush3.bf16.msra.mxu0 %v1224_v1  ;;  %1192 = vmatpush3.bf16.msra.mxu1 %v1224_v1  ;;  %v1238_v15 = vld [vmem:[%s1326_s25 + $0x58] sm:$0xff]   ;;  %v1240_v17 = vld [vmem:[%s1326_s25 + $0x60] sm:$0xff]   ;;  %v1242_v19 = vld [vmem:[%s1326_s25 + $0x68] sm:$0xff]  }
  0x13   : > { %1139 = vmatprep.subr.bf16.mxu0 %v1225_v2  ;;  %1185 = vmatprep.subr.bf16.mxu1 %v1225_v2  ;;  %v1243_v20 = vld [vmem:[%s1326_s25 + $0x30] sm:$0xff]   ;;  %v1245_v22 = vld [vmem:[%s1326_s25 + $0x38] sm:$0xff]   ;;  %v1362_v24 = vld [vmem:[%s1434_s2] ss:$0 sm:$0xff] }
  0x14   : > { %v1244_v21 = vld [vmem:[%s1326_s25 + $0x70] sm:$0xff]   ;;  %v1246_v23 = vld [vmem:[%s1326_s25 + $0x78] sm:$0xff]  }
  0x16   : > { %1140 = vmatpush3.bf16.msra.mxu0 %v1225_v2  ;;  %1193 = vmatpush3.bf16.msra.mxu1 %v1225_v2 }
  0x17   : > { %1141 = vmatprep.subr.bf16.mxu0 %v1226_v3  ;;  %1186 = vmatprep.subr.bf16.mxu1 %v1226_v3 }
  0x1a   : > { %1142 = vmatpush3.bf16.msra.mxu0 %v1226_v3  ;;  %1194 = vmatpush3.bf16.msra.mxu1 %v1226_v3 }
  0x1b   : > { %1143 = vmatprep.subr.bf16.mxu0 %v1227_v6  ;;  %1187 = vmatprep.subr.bf16.mxu1 %v1227_v6 }
  0x1e   : > { %1144 = vmatpush3.bf16.msra.mxu0 %v1227_v6  ;;  %1195 = vmatpush3.bf16.msra.mxu1 %v1227_v6 }
  0x1f   : > { %1145 = vmatprep.subr.bf16.mxu0 %v1228_v7  ;;  %1188 = vmatprep.subr.bf16.mxu1 %v1228_v7 }
  0x22   : > { %1146 = vmatpush3.bf16.msra.mxu0 %v1228_v7  ;;  %1196 = vmatpush3.bf16.msra.mxu1 %v1228_v7 }
  0x23   : > { %1147 = vmatprep.subr.bf16.mxu0 %v1229_v8  ;;  %1189 = vmatprep.subr.bf16.mxu1 %v1229_v8 }
  0x26   : > { %1148 = vmatpush3.bf16.msra.mxu0 %v1229_v8  ;;  %1197 = vmatpush3.bf16.msra.mxu1 %v1229_v8 }
  0x27   : > { %1149 = vmatprep.subr.bf16.mxu0 %v1230_v9  ;;  %1190 = vmatprep.subr.bf16.mxu1 %v1230_v9 }
  0x2a   : > { %1150 = vmatpush3.bf16.msra.mxu0 %v1230_v9  ;;  %1198 = vmatpush3.bf16.msra.mxu1 %v1230_v9 }
  0x2d   : > { %1152 = vmatmul.mubr.bf16.vlgmr.msra.gmra.mxu0 %v1233_v10  ;;  %1168 = vmatmul.mubr.bf16.vlgmr.msra.gmra.mxu1 %v1234_v11 }
  0x2e   : > { %1155 = vmatprep.mubr.bf16.mxu0 %v1235_v12  ;;  %1171 = vmatprep.mubr.bf16.mxu1 %v1236_v13 }
  0x35   : > { %1156 = vmatmul.mubr.bf16.gmra.mxu0 %v1237_v14  ;;  %1172 = vmatmul.mubr.bf16.gmra.mxu1 %v1238_v15 }
  0x36   : > { %1159 = vmatprep.mubr.bf16.mxu0 %v1239_v16  ;;  %1175 = vmatprep.mubr.bf16.mxu1 %v1240_v17 }
  0x3d   : > { %1160 = vmatmul.mubr.bf16.gmra.mxu0 %v1241_v18  ;;  %1176 = vmatmul.mubr.bf16.gmra.mxu1 %v1242_v19 }
  0x3e   : > { %1163 = vmatprep.mubr.bf16.mxu0 %v1243_v20  ;;  %1179 = vmatprep.mubr.bf16.mxu1 %v1244_v21 }
  0x45   : > { %1164 = vmatmul.mubr.bf16.gmra.mxu0 %v1245_v22  ;;  %1180 = vmatmul.mubr.bf16.gmra.mxu1 %v1246_v23 }
  0xed   : > { %v1153_v25 = vpop.f32.mrf.mxu0  ;;  %v1169_v26 = vpop.f32.mrf.mxu1 }
  0xee   : > { %v453_v27 = vadd.f32 %v1153_v25, %v1362_v24  ;;  %v517_v28 = vadd.f32 %v1169_v26, %v1362_v24 }
  0xef   : > { %v444_v29 = vpop.f32.mrf.mxu0  ;;  %v508_v30 = vpop.f32.mrf.mxu1 }
  0xf0   : > { %vm573_vm0 = vcmp.ge.f32.partialorder %v453_v27, 0.0  ;;  %v605_v31 = vmul.f32 0.2, %v453_v27  ;;  %vm589_vm1 = vcmp.ge.f32.partialorder %v517_v28, 0.0  ;;  %v621_v32 = vmul.f32 0.2, %v517_v28 }
  0xf1   : > { %v445_v33 = vadd.f32 %v1362_v24, %v444_v29  ;;  %v509_v34 = vadd.f32 %v1362_v24, %v508_v30  ;;  %v1154_v35 = vpop.f32.mrf.mxu0  ;;  %v1170_v36 = vpop.f32.mrf.mxu1 }
  0xf2   : > { %v637_v37 = vsel %vm573_vm0, %v453_v27, %v605_v31  ;;  %v456_v38 = vadd.f32 %v1154_v35, %v1362_v24  ;;  %v520_v39 = vadd.f32 %v1170_v36, %v1362_v24  ;;  %v653_v40 = vsel %vm589_vm1, %v517_v28, %v621_v32 }
  0xf3   : > { %vm571_vm2 = vcmp.ge.f32.partialorder %v445_v33, 0.0  ;;  %v603_v41 = vmul.f32 0.2, %v445_v33  ;;  %vm587_vm3 = vcmp.ge.f32.partialorder %v509_v34, 0.0  ;;  %v447_v42 = vpop.f32.mrf.mxu0  ;;  %v511_v43 = vpop.f32.mrf.mxu1  ;;  %v619_v47 = vmul.f32 0.2, %v509_v34 }
  0xf4   : > { %vm574_vm4 = vcmp.ge.f32.partialorder %v456_v38, 0.0  ;;  %v606_v44 = vmul.f32 0.2, %v456_v38  ;;  %vm590_vm5 = vcmp.ge.f32.partialorder %v520_v39, 0.0  ;;  %v622_v45 = vmul.f32 0.2, %v520_v39 }
  0xf5   : > { %v635_v46 = vsel %vm571_vm2, %v445_v33, %v603_v41  ;;  %v448_v48 = vadd.f32 %v1362_v24, %v447_v42  ;;  %v512_v49 = vadd.f32 %v1362_v24, %v511_v43  ;;  %v1157_v50 = vpop.f32.mrf.mxu0  ;;  %v1173_v51 = vpop.f32.mrf.mxu1  ;;  %v651_v63 = vsel %vm587_vm3, %v509_v34, %v619_v47 }
  0xf6   : > { %v638_v52 = vsel %vm574_vm4, %v456_v38, %v606_v44  ;;  %v654_v53 = vsel %vm590_vm5, %v520_v39, %v622_v45  ;;  %v469_v54 = vadd.f32 %v1157_v50, %v1362_v24  ;;  %v533_v55 = vadd.f32 %v1173_v51, %v1362_v24 }
  0xf7   : > { %v1024_v56 = vpack.c.bf16 %v638_v52, %v637_v37  ;;  %v1064_v57 = vpack.c.bf16 %v654_v53, %v653_v40  ;;  %vm572_vm6 = vcmp.ge.f32.partialorder %v448_v48, 0.0  ;;  %v604_v58 = vmul.f32 0.2, %v448_v48  ;;  %v460_v59 = vpop.f32.mrf.mxu0  ;;  %v524_v60 = vpop.f32.mrf.mxu1 }
  0xf8   : > { %vm588_vm7 = vcmp.ge.f32.partialorder %v512_v49, 0.0  ;;  %v620_v61 = vmul.f32 0.2, %v512_v49  ;;  %vm577_vm8 = vcmp.ge.f32.partialorder %v469_v54, 0.0  ;;  %v609_v62 = vmul.f32 0.2, %v469_v54 }
  0xf9   : > { %1096 = vst [vmem:[%s1377_s17 + $0x8] sm:$0xff] %v1024_v56   ;;  %1104 = vst [vmem:[%s1377_s17 + $0x48] sm:$0xff] %v1064_v57   ;;  %v636_v0 = vsel %vm572_vm6, %v448_v48, %v604_v58  ;;  %v625_v1 = vmul.f32 0.2, %v533_v55  ;;  %v461_v2 = vadd.f32 %v1362_v24, %v460_v59  ;;  %v1158_v3 = vpop.f32.mrf.mxu0  ;;  %v1174_v4 = vpop.f32.mrf.mxu1  ;;  %vm593_vm9 = vcmp.ge.f32.partialorder %v533_v55, 0.0 }
  0xfa   : > { %v1019_v5 = vpack.c.bf16 %v636_v0, %v635_v46  ;;  %v652_v6 = vsel %vm588_vm7, %v512_v49, %v620_v61  ;;  %v525_v7 = vadd.f32 %v1362_v24, %v524_v60  ;;  %v641_v9 = vsel %vm577_vm8, %v469_v54, %v609_v62 }
  0xfb   : > { %v1059_v8 = vpack.c.bf16 %v652_v6, %v651_v63  ;;  %vm575_vm10 = vcmp.ge.f32.partialorder %v461_v2, 0.0  ;;  %v607_v10 = vmul.f32 0.2, %v461_v2  ;;  %v463_v11 = vpop.f32.mrf.mxu0  ;;  %v527_v12 = vpop.f32.mrf.mxu1  ;;  %v472_v14 = vadd.f32 %v1158_v3, %v1362_v24 }
  0xfc   : > { %1020 = vst [vmem:[%s1377_s17] sm:$0xff] %v1019_v5   ;;  %vm591_vm11 = vcmp.ge.f32.partialorder %v525_v7, 0.0  ;;  %v623_v13 = vmul.f32 0.2, %v525_v7  ;;  %v536_v15 = vadd.f32 %v1174_v4, %v1362_v24  ;;  %v657_v16 = vsel %vm593_vm9, %v533_v55, %v625_v1 }
  0xfd   : > { %1103 = vst [vmem:[%s1377_s17 + $0x40] sm:$0xff] %v1059_v8   ;;  %v639_v17 = vsel %vm575_vm10, %v461_v2, %v607_v10  ;;  %v464_v18 = vadd.f32 %v1362_v24, %v463_v11  ;;  %v528_v19 = vadd.f32 %v1362_v24, %v527_v12  ;;  %v1161_v20 = vpop.f32.mrf.mxu0  ;;  %v1177_v21 = vpop.f32.mrf.mxu1  ;;  %vm578_vm12 = vcmp.ge.f32.partialorder %v472_v14, 0.0 }
  0xfe   : > { %v655_v22 = vsel %vm591_vm11, %v525_v7, %v623_v13  ;;  %v610_v23 = vmul.f32 0.2, %v472_v14  ;;  %vm594_vm13 = vcmp.ge.f32.partialorder %v536_v15, 0.0  ;;  %v626_v25 = vmul.f32 0.2, %v536_v15 }
  0xff   : > { %vm576_vm14 = vcmp.ge.f32.partialorder %v464_v18, 0.0  ;;  %v608_v26 = vmul.f32 0.2, %v464_v18  ;;  %vm592_vm15 = vcmp.ge.f32.partialorder %v528_v19, 0.0  ;;  %v476_v27 = vpop.f32.mrf.mxu0  ;;  %v540_v28 = vpop.f32.mrf.mxu1  ;;  %v624_v30 = vmul.f32 0.2, %v528_v19 }
 0x100   : > { %v642_v29 = vsel %vm578_vm12, %v472_v14, %v610_v23  ;;  %v485_v31 = vadd.f32 %v1161_v20, %v1362_v24  ;;  %v549_v32 = vadd.f32 %v1177_v21, %v1362_v24  ;;  %v658_v34 = vsel %vm594_vm13, %v536_v15, %v626_v25 }
 0x101   : > { %v1034_v33 = vpack.c.bf16 %v642_v29, %v641_v9  ;;  %v640_v35 = vsel %vm576_vm14, %v464_v18, %v608_v26  ;;  %v477_v36 = vadd.f32 %v1362_v24, %v476_v27  ;;  %v1162_v37 = vpop.f32.mrf.mxu0  ;;  %v1178_v38 = vpop.f32.mrf.mxu1  ;;  %v1074_v39 = vpack.c.bf16 %v658_v34, %v657_v16 }
 0x102   : > { %v1029_v40 = vpack.c.bf16 %v640_v35, %v639_v17  ;;  %v656_v41 = vsel %vm592_vm15, %v528_v19, %v624_v30  ;;  %vm581_vm0 = vcmp.ge.f32.partialorder %v485_v31, 0.0  ;;  %v613_v43 = vmul.f32 0.2, %v485_v31 }
 0x103   : > { %1098 = vst [vmem:[%s1377_s17 + $0x18] sm:$0xff] %v1034_v33   ;;  %v1069_v42 = vpack.c.bf16 %v656_v41, %v655_v22  ;;  %vm597_vm1 = vcmp.ge.f32.partialorder %v549_v32, 0.0  ;;  %v629_v44 = vmul.f32 0.2, %v549_v32  ;;  %v479_v45 = vpop.f32.mrf.mxu0  ;;  %v543_v46 = vpop.f32.mrf.mxu1  ;;  %1106 = vst [vmem:[%s1377_s17 + $0x58] sm:$0xff] %v1074_v39   ;;  %vm579_vm2 = vcmp.ge.f32.partialorder %v477_v36, 0.0 }
 0x104   : > { %1097 = vst [vmem:[%s1377_s17 + $0x10] sm:$0xff] %v1029_v40   ;;  %v611_v47 = vmul.f32 0.2, %v477_v36  ;;  %v541_v48 = vadd.f32 %v1362_v24, %v540_v28  ;;  %v488_v49 = vadd.f32 %v1162_v37, %v1362_v24  ;;  %v645_v50 = vsel %vm581_vm0, %v485_v31, %v613_v43 }
 0x105   : > { %1105 = vst [vmem:[%s1377_s17 + $0x50] sm:$0xff] %v1069_v42   ;;  %v552_v51 = vadd.f32 %v1178_v38, %v1362_v24  ;;  %v480_v52 = vadd.f32 %v1362_v24, %v479_v45  ;;  %v1165_v53 = vpop.f32.mrf.mxu0  ;;  %v1181_v54 = vpop.f32.mrf.mxu1  ;;  %v661_v55 = vsel %vm597_vm1, %v549_v32, %v629_v44  ;;  %v544_v63 = vadd.f32 %v1362_v24, %v543_v46 }
 0x106   : > { %v643_v56 = vsel %vm579_vm2, %v477_v36, %v611_v47  ;;  %vm595_vm3 = vcmp.ge.f32.partialorder %v541_v48, 0.0  ;;  %vm582_vm4 = vcmp.ge.f32.partialorder %v488_v49, 0.0  ;;  %v614_v57 = vmul.f32 0.2, %v488_v49 }
 0x107   : > { %vm598_vm5 = vcmp.ge.f32.partialorder %v552_v51, 0.0  ;;  %v630_v58 = vmul.f32 0.2, %v552_v51  ;;  %vm580_vm6 = vcmp.ge.f32.partialorder %v480_v52, 0.0  ;;  %v492_v59 = vpop.f32.mrf.mxu0  ;;  %v556_v60 = vpop.f32.mrf.mxu1  ;;  %v627_v61 = vmul.f32 0.2, %v541_v48 }
 0x108   : > { %v612_v62 = vmul.f32 0.2, %v480_v52  ;;  %v501_v0 = vadd.f32 %v1165_v53, %v1362_v24  ;;  %v646_v1 = vsel %vm582_vm4, %v488_v49, %v614_v57  ;;  %v565_v3 = vadd.f32 %v1181_v54, %v1362_v24 }
 0x109   : > { %v662_v2 = vsel %vm598_vm5, %v552_v51, %v630_v58  ;;  %v493_v4 = vadd.f32 %v1362_v24, %v492_v59  ;;  %v1166_v5 = vpop.f32.mrf.mxu0  ;;  %v1182_v6 = vpop.f32.mrf.mxu1  ;;  %v1044_v7 = vpack.c.bf16 %v646_v1, %v645_v50  ;;  %vm596_vm7 = vcmp.ge.f32.partialorder %v544_v63, 0.0 }
 0x10a   : > { %v1084_v8 = vpack.c.bf16 %v662_v2, %v661_v55  ;;  %v644_v9 = vsel %vm580_vm6, %v480_v52, %v612_v62  ;;  %v628_v11 = vmul.f32 0.2, %v544_v63  ;;  %v617_v12 = vmul.f32 0.2, %v501_v0 }
 0x10b   : > { %v1039_v10 = vpack.c.bf16 %v644_v9, %v643_v56  ;;  %v659_v13 = vsel %vm595_vm3, %v541_v48, %v627_v61  ;;  %1100 = vst [vmem:[%s1377_s17 + $0x28] sm:$0xff] %v1044_v7   ;;  %vm585_vm8 = vcmp.ge.f32.partialorder %v501_v0, 0.0  ;;  %v633_v15 = vmul.f32 0.2, %v565_v3  ;;  %v495_v18 = vpop.f32.mrf.mxu0  ;;  %v559_v19 = vpop.f32.mrf.mxu1 }
 0x10c   : > { %1108 = vst [vmem:[%s1377_s17 + $0x68] sm:$0xff] %v1084_v8   ;;  %v660_v14 = vsel %vm596_vm7, %v544_v63, %v628_v11  ;;  %v557_v16 = vadd.f32 %v1362_v24, %v556_v60  ;;  %v504_v17 = vadd.f32 %v1166_v5, %v1362_v24  ;;  %vm601_vm9 = vcmp.ge.f32.partialorder %v565_v3, 0.0 }
 0x10d   : > { %1099 = vst [vmem:[%s1377_s17 + $0x20] sm:$0xff] %v1039_v10   ;;  %v1079_v20 = vpack.c.bf16 %v660_v14, %v659_v13  ;;  %vm583_vm10 = vcmp.ge.f32.partialorder %v493_v4, 0.0  ;;  %v568_v21 = vadd.f32 %v1182_v6, %v1362_v24  ;;  %v649_v22 = vsel %vm585_vm8, %v501_v0, %v617_v12 }
 0x10e   : > { %v615_v23 = vmul.f32 0.2, %v493_v4  ;;  %vm586_vm11 = vcmp.ge.f32.partialorder %v504_v17, 0.0  ;;  %v618_v25 = vmul.f32 0.2, %v504_v17  ;;  %v496_v27 = vadd.f32 %v1362_v24, %v495_v18 }
 0x10f   : > { %1107 = vst [vmem:[%s1377_s17 + $0x60] sm:$0xff] %v1079_v20   ;;  %vm602_vm12 = vcmp.ge.f32.partialorder %v568_v21, 0.0  ;;  %v634_v26 = vmul.f32 0.2, %v568_v21  ;;  %v560_v28 = vadd.f32 %v1362_v24, %v559_v19  ;;  %v665_v29 = vsel %vm601_vm9, %v565_v3, %v633_v15 }
 0x110   : > { %vm599_vm13 = vcmp.ge.f32.partialorder %v557_v16, 0.0  ;;  %v631_v30 = vmul.f32 0.2, %v557_v16  ;;  %v650_v31 = vsel %vm586_vm11, %v504_v17, %v618_v25  ;;  %vm584_vm14 = vcmp.ge.f32.partialorder %v496_v27, 0.0 }
 0x111   : > { %v1054_v32 = vpack.c.bf16 %v650_v31, %v649_v22  ;;  %v666_v33 = vsel %vm602_vm12, %v568_v21, %v634_v26  ;;  %v616_v34 = vmul.f32 0.2, %v496_v27  ;;  %vm600_vm15 = vcmp.ge.f32.partialorder %v560_v28, 0.0 }
 0x112   : > { %v1094_v35 = vpack.c.bf16 %v666_v33, %v665_v29  ;;  %v632_v36 = vmul.f32 0.2, %v560_v28  ;;  %v647_v37 = vsel %vm583_vm10, %v493_v4, %v615_v23  ;;  %v663_v39 = vsel %vm599_vm13, %v557_v16, %v631_v30 }
 0x113   : > { %1102 = vst [vmem:[%s1377_s17 + $0x38] sm:$0xff] %v1054_v32   ;;  %v648_v38 = vsel %vm584_vm14, %v496_v27, %v616_v34 }
 0x114   : > { %1110 = vst [vmem:[%s1377_s17 + $0x78] sm:$0xff] %v1094_v35   ;;  %v1049_v24 = vpack.c.bf16 %v648_v38, %v647_v37  ;;  %v664_v40 = vsel %vm600_vm15, %v560_v28, %v632_v36 }
 0x115   : > { %v1089_v41 = vpack.c.bf16 %v664_v40, %v663_v39 }
 0x116   : > { %1101 = vst [vmem:[%s1377_s17 + $0x30] sm:$0xff] %v1049_v24  }
 0x117   : > { %1109 = vst [vmem:[%s1377_s17 + $0x70] sm:$0xff] %v1089_v41  }
 0x118 PF: > { %s13_s14 = sadd.s32 1, %s1269_s14   ;;  %s1436_s12 = smov %s1265_s13 }
 0x119   : > { %p10_p5 = scmp.ge.s32.totalorder %s13_s14, 4   ;;  %s1437_s13 = smov %s1439_s15 }
 0x11b   :  { %12 = sbr.rel (!%p10_p5) target bundleno = 2 (0x2), region = 62 }

</bundles_post_ra>
